<compile_context>
chip_gen: v5e
topology: v5e:2x2
jax: 0.10.0
libtpu: 0.0.40
codegen_flags: <defaults>
</compile_context>

<pallas_src>
import functools

import jax
import jax.numpy as jnp
from jax.experimental import pallas as pl
from jax.experimental.pallas import tpu as pltpu


def _round_up(v, m):
    return ((v + m - 1) // m) * m


def _softmax_lanes(x):
    # softmax over the (unpadded) feature/channel dim; EUP exp + approx reciprocal.
    m = jnp.max(x, axis=-1, keepdims=True)
    e = jnp.exp(x - m)
    s = jnp.sum(e, axis=-1, keepdims=True)
    return e * pl.reciprocal(s, approx=True)


def graph_model_kernel(
    x_ref, ahat_ref,
    w1g_ref, b1g_ref, w2g_ref, b2g_ref,
    mnode_ref, mnode_t_ref,
    ea_ref, w1e_ref, w2e_ref, b2e_ref, medge_ref,
    pn_ref, pe_ref, fcw_ref, fcb_ref,
    out_ref, gf_ref,
):
    f32 = jnp.float32
    ncols = w2g_ref.shape[1]            # node_out + 1 (gate fused as the last column)

    # ---------------- NodeGCN: GCNConv -> softmax(features) -> GCNConv -------------
    x = x_ref[...]                      # (N, Din)
    ahat = ahat_ref[...]                # (N, N) normalized adjacency with self loops
    h = jnp.dot(x, w1g_ref[...], preferred_element_type=f32)
    h = jnp.dot(ahat, h, preferred_element_type=f32) + b1g_ref[...]
    h = _softmax_lanes(h)               # F.softmax(..., dim=1) over features
    h = jnp.dot(h, w2g_ref[...], preferred_element_type=f32)
    nf_ext = jnp.dot(ahat, h, preferred_element_type=f32) + b2g_ref[...]  # (N, Dn+1)

    # ---------------- GlobalAttention pooling over nodes (per graph) ---------------
    M = mnode_ref[...]                  # (Gp, N) one-hot membership (zero rows = pad)
    Mt = mnode_t_ref[...]               # (N, Gp) precomputed transpose
    gate = nf_ext[:, ncols - 1:ncols]   # (N, 1) fused gate column
    neg = jnp.float32(-1e30)
    seg_max = jnp.max(jnp.where(M > 0, gate.T, neg), axis=1, keepdims=True)  # (Gp,1)
    node_max = jnp.dot(Mt, seg_max, preferred_element_type=f32)              # (N,1)
    e = jnp.exp(gate - node_max)
    seg_sum = jnp.dot(M, e, preferred_element_type=f32)                      # (Gp,1)
    node_den = jnp.dot(Mt, seg_sum, preferred_element_type=f32)              # (N,1)
    alpha = e * pl.reciprocal(node_den, approx=True)                         # per-graph softmax
    pooled_node = jnp.dot(M, alpha * nf_ext, preferred_element_type=f32)     # (Gp, Dn+1)

    # ---------------- EdgeCNN: 1x1 conv -> softmax(channels) -> 1x1 conv -----------
    h1 = jnp.dot(ea_ref[...], w1e_ref[...], preferred_element_type=f32)  # bias folded
    h1 = _softmax_lanes(h1)
    ef = jnp.dot(h1, w2e_ref[...], preferred_element_type=f32) + b2e_ref[...]  # (E, Eout)
    # mean-pool: medge is pre-normalized rows (and empty-graph safe) in the wrapper
    pooled_edge = jnp.dot(medge_ref[...], ef, preferred_element_type=f32)      # (Gp, Eout)

    # --------- lane-dense "concat" via placement matmuls + final linear ------------
    gf = (jnp.dot(pooled_node, pn_ref[...], preferred_element_type=f32)
          + jnp.dot(pooled_edge, pe_ref[...], preferred_element_type=f32))     # (Gp, GFp)
    gf_ref[...] = gf
    out_ref[...] = jnp.dot(gf, fcw_ref[...], preferred_element_type=f32) + fcb_ref[...]


def build_ahat(edge_index, num_nodes):
    """GCN normalization: D^-1/2 (A + I) D^-1/2, messages src -> dst."""
    src, dst = edge_index[0], edge_index[1]
    loop = jnp.arange(num_nodes, dtype=src.dtype)
    src = jnp.concatenate([src, loop])
    dst = jnp.concatenate([dst, loop])
    ones = jnp.ones(src.shape, jnp.float32)
    deg = jnp.zeros((num_nodes,), jnp.float32).at[dst].add(ones)
    dinv = jnp.where(deg > 0, deg ** -0.5, 0.0)
    norm = dinv[src] * dinv[dst]
    A = jnp.zeros((num_nodes, num_nodes), jnp.float32).at[dst, src].add(norm)
    return A


@functools.partial(jax.jit, static_argnums=(5, 6))
def graph_model_forward(x, edge_index, edge_attr, batch, params, num_graphs, final_dim):
    N = x.shape[0]
    E = edge_attr.shape[0]
    din, hid = params["w1g"].shape
    node_out = params["w2g"].shape[1]
    ein = params["w1e"].shape[0]
    edge_out = params["w2e"].shape[1]
    graph_dim = node_out + edge_out

    # ------------- wrapper-side preprocessing (cheap XLA glue, done once) ----------
    # NOTE: at scale, cache ahat across forward calls instead of rebuilding it.
    ahat = build_ahat(edge_index, N)

    Gp = _round_up(num_graphs, 8)                       # pad graphs to a full sublane
    mnode = jax.nn.one_hot(batch, Gp, dtype=jnp.float32).T               # (Gp, N)
    edge_batch = batch[edge_index[0]]
    medge = jax.nn.one_hot(edge_batch, Gp, dtype=jnp.float32).T          # (Gp, E)
    counts = jnp.maximum(jnp.sum(medge, axis=1, keepdims=True), 1.0)     # empty-graph safe
    medge_norm = medge / counts

    # fuse the attention gate projection into the 2nd GCN layer (last output column)
    w2g_ext = jnp.concatenate([params["w2g"], params["w2g"] @ params["gate_w"]], axis=1)
    b2g_ext = jnp.concatenate(
        [params["b2g"], params["b2g"] @ params["gate_w"] + params["gate_b"]], axis=1)

    # fold the first edge-conv bias into its weight (ones column on edge_attr)
    ea_aug = jnp.concatenate([edge_attr, jnp.ones((E, 1), jnp.float32)], axis=1)
    w1e_aug = jnp.concatenate([params["w1e"], params["b1e"]], axis=0)

    # lane-dense output padding + placement matrices (replace in-kernel concat)
    GF_pad = _round_up(graph_dim, 128)
    F_pad = _round_up(final_dim, 128)
    pn = jnp.zeros((node_out + 1, GF_pad), jnp.float32).at[:node_out, :node_out].set(
        jnp.eye(node_out, dtype=jnp.float32))
    pe = jnp.zeros((edge_out, GF_pad), jnp.float32).at[:, node_out:graph_dim].set(
        jnp.eye(edge_out, dtype=jnp.float32))
    fc_w_pad = jnp.zeros((GF_pad, F_pad), jnp.float32).at[:graph_dim, :final_dim].set(
        params["fc_w"])
    fcb_pad = jnp.zeros((1, F_pad), jnp.float32).at[:, :final_dim].set(params["fc_b"])

    inputs = (
        x, ahat,
        params["w1g"], params["b1g"], w2g_ext, b2g_ext,
        mnode, mnode.T,
        ea_aug, w1e_aug, params["w2e"], params["b2e"], medge_norm,
        pn, pe, fc_w_pad, fcb_pad,
    )

    flops = 2 * (
        N * din * hid + N * N * hid
        + N * hid * (node_out + 1) + N * N * (node_out + 1)
        + 3 * Gp * N + Gp * N * (node_out + 1)
        + E * (ein + 1) * edge_out + E * edge_out * edge_out + Gp * E * edge_out
        + Gp * (node_out + 1) * GF_pad + Gp * edge_out * GF_pad + Gp * GF_pad * F_pad
    )
    transcendentals = N * hid + N + E * edge_out
    bytes_accessed = sum(int(a.size) for a in inputs) * 4 + Gp * (F_pad + GF_pad) * 4

    vmem = lambda: pl.BlockSpec(memory_space=pltpu.MemorySpace.VMEM)
    out_pad, gf_pad = pl.pallas_call(
        graph_model_kernel,
        out_shape=(
            jax.ShapeDtypeStruct((Gp, F_pad), jnp.float32),
            jax.ShapeDtypeStruct((Gp, GF_pad), jnp.float32),
        ),
        in_specs=[vmem() for _ in inputs],
        out_specs=(vmem(), vmem()),
        compiler_params=pltpu.CompilerParams(vmem_limit_bytes=32 * 1024 * 1024),
        cost_estimate=pl.CostEstimate(
            flops=flops, transcendentals=transcendentals, bytes_accessed=bytes_accessed),
    )(*inputs)
    # NOTE: if N grows so that the dense (N,N) ahat no longer fits VMEM (v7x: 64 MiB),
    # the ahat matmuls must be tiled over a (row-parallel, K-arbitrary) grid.
    return out_pad[:num_graphs, :final_dim], gf_pad[:num_graphs, :graph_dim]


def reference_forward(x, edge_index, edge_attr, batch, params, num_graphs):
    """Pure-JAX reference mirroring the PyTorch semantics."""
    ahat = build_ahat(edge_index, x.shape[0])
    h = ahat @ (x @ params["w1g"]) + params["b1g"]
    h = jax.nn.softmax(h, axis=1)
    node_feat = ahat @ (h @ params["w2g"]) + params["b2g"]

    gate = node_feat @ params["gate_w"] + params["gate_b"]        # (N,1)
    gate = gate[:, 0]
    seg_max = jnp.full((num_graphs,), -jnp.inf).at[batch].max(gate)
    e = jnp.exp(gate - seg_max[batch])
    seg_sum = jnp.zeros((num_graphs,)).at[batch].add(e)
    alpha = e / seg_sum[batch]
    pooled_node = jnp.zeros((num_graphs, node_feat.shape[1])).at[batch].add(
        alpha[:, None] * node_feat)

    h1 = jax.nn.softmax(edge_attr @ params["w1e"] + params["b1e"], axis=1)
    ef = h1 @ params["w2e"] + params["b2e"]
    edge_batch = batch[edge_index[0]]
    sums = jnp.zeros((num_graphs, ef.shape[1])).at[edge_batch].add(ef)
    cnts = jnp.zeros((num_graphs,)).at[edge_batch].add(1.0)
    pooled_edge = sums / cnts[:, None]

    gf = jnp.concatenate([pooled_node, pooled_edge], axis=-1)
    out = gf @ params["fc_w"] + params["fc_b"]
    return out, gf


if __name__ == "__main__":
    # small shapes consistent with the module
    N, G = 16, 2                    # 16 nodes, 2 graphs (8 nodes each)
    E = 32                          # 16 edges per graph
    node_in, node_hid, node_out = 8, 16, 16
    edge_in, edge_out = 8, 8
    final_dim = 4

    key = jax.random.PRNGKey(0)
    ks = jax.random.split(key, 12)

    # node features / edge attrs / connectivity
    x = jax.random.normal(ks[0], (N, node_in), jnp.float32)
    edge_attr = jax.random.normal(ks[1], (E, edge_in), jnp.float32)
    per_graph = N // G
    src_local = jax.random.randint(ks[2], (E,), 0, per_graph)
    offs = jax.random.randint(ks[3], (E,), 1, per_graph)     # avoid self loops
    dst_local = (src_local + offs) % per_graph
    graph_of_edge = jnp.repeat(jnp.arange(G), E // G)
    src = src_local + graph_of_edge * per_graph
    dst = dst_local + graph_of_edge * per_graph
    edge_index = jnp.stack([src, dst]).astype(jnp.int32)
    batch = jnp.repeat(jnp.arange(G), per_graph).astype(jnp.int32)

    # deterministic parameter init (GCNConv weights, Conv1d(k=1) weights, gate, fc)
    s = 0.1
    params = {
        "w1g": s * jax.random.normal(ks[4], (node_in, node_hid), jnp.float32),
        "b1g": jnp.zeros((1, node_hid), jnp.float32),
        "w2g": s * jax.random.normal(ks[5], (node_hid, node_out), jnp.float32),
        "b2g": jnp.zeros((1, node_out), jnp.float32),
        "gate_w": s * jax.random.normal(ks[6], (node_out, 1), jnp.float32),
        "gate_b": jnp.zeros((1, 1), jnp.float32),
        "w1e": s * jax.random.normal(ks[7], (edge_in, edge_out), jnp.float32),
        "b1e": 0.01 * jnp.ones((1, edge_out), jnp.float32),
        "w2e": s * jax.random.normal(ks[8], (edge_out, edge_out), jnp.float32),
        "b2e": 0.01 * jnp.ones((1, edge_out), jnp.float32),
        "fc_w": s * jax.random.normal(ks[9], (node_out + edge_out, final_dim), jnp.float32),
        "fc_b": 0.01 * jnp.ones((1, final_dim), jnp.float32),
    }

    out, gf = graph_model_forward(x, edge_index, edge_attr, batch, params, G, final_dim)
    out = jax.block_until_ready(out)
    gf = jax.block_until_ready(gf)

    out_ref, gf_ref = reference_forward(x, edge_index, edge_attr, batch, params, G)
    assert jnp.allclose(out, out_ref, atol=2e-3, rtol=2e-3)
    assert jnp.allclose(gf, gf_ref, atol=2e-3, rtol=2e-3)

    print("KERNEL_OK")
</pallas_src>

<mosaic_0001>
module attributes {stable_mosaic.version = 11 : i64} {
  func.func @graph_model_kernel(%arg0: memref<16x8xf32, #tpu.memory_space<vmem>>, %arg1: memref<16x16xf32, #tpu.memory_space<vmem>>, %arg2: memref<8x16xf32, #tpu.memory_space<vmem>>, %arg3: memref<1x16xf32, #tpu.memory_space<vmem>>, %arg4: memref<16x17xf32, #tpu.memory_space<vmem>>, %arg5: memref<1x17xf32, #tpu.memory_space<vmem>>, %arg6: memref<8x16xf32, #tpu.memory_space<vmem>>, %arg7: memref<16x8xf32, #tpu.memory_space<vmem>>, %arg8: memref<32x9xf32, #tpu.memory_space<vmem>>, %arg9: memref<9x8xf32, #tpu.memory_space<vmem>>, %arg10: memref<8x8xf32, #tpu.memory_space<vmem>>, %arg11: memref<1x8xf32, #tpu.memory_space<vmem>>, %arg12: memref<8x32xf32, #tpu.memory_space<vmem>>, %arg13: memref<17x128xf32, #tpu.memory_space<vmem>>, %arg14: memref<8x128xf32, #tpu.memory_space<vmem>>, %arg15: memref<128x128xf32, #tpu.memory_space<vmem>>, %arg16: memref<1x128xf32, #tpu.memory_space<vmem>>, %arg17: memref<8x128xf32, #tpu.memory_space<vmem>>, %arg18: memref<8x128xf32, #tpu.memory_space<vmem>>) attributes {dimension_semantics = [], scalar_prefetch = 0 : i64, scratch_operands = 0 : i64, tpu.core_type = #tpu.core_type<tc>} {
    %c0 = arith.constant 0 : index
    %c0_0 = arith.constant 0 : index
    %0 = vector.load %arg0[%c0, %c0_0] : memref<16x8xf32, #tpu.memory_space<vmem>>, vector<16x8xf32>
    %c0_1 = arith.constant 0 : index
    %c0_2 = arith.constant 0 : index
    %1 = vector.load %arg1[%c0_1, %c0_2] : memref<16x16xf32, #tpu.memory_space<vmem>>, vector<16x16xf32>
    %c0_3 = arith.constant 0 : index
    %c0_4 = arith.constant 0 : index
    %2 = vector.load %arg2[%c0_3, %c0_4] : memref<8x16xf32, #tpu.memory_space<vmem>>, vector<8x16xf32>
    %cst = arith.constant dense<0.000000e+00> : vector<16x16xf32>
    %3 = tpu.matmul %0, %2, %cst {dimension_numbers = #tpu.dot_dimension_numbers<[1], [0], [0], [1], [0, 0, 1, 1], [], []>} : vector<16x8xf32>, vector<8x16xf32>, vector<16x16xf32> -> vector<16x16xf32>
    %cst_5 = arith.constant dense<0.000000e+00> : vector<16x16xf32>
    %4 = tpu.matmul %1, %3, %cst_5 {dimension_numbers = #tpu.dot_dimension_numbers<[1], [0], [0], [1], [0, 0, 1, 1], [], []>} : vector<16x16xf32>, vector<16x16xf32>, vector<16x16xf32> -> vector<16x16xf32>
    %c0_6 = arith.constant 0 : index
    %c0_7 = arith.constant 0 : index
    %5 = vector.load %arg3[%c0_6, %c0_7] : memref<1x16xf32, #tpu.memory_space<vmem>>, vector<1x16xf32>
    %6 = vector.broadcast %5 : vector<1x16xf32> to vector<16x16xf32>
    %7 = arith.addf %4, %6 : vector<16x16xf32>
    %cst_8 = arith.constant dense<0xFF800000> : vector<16xf32>
    %8 = vector.multi_reduction <maximumf>, %7, %cst_8 [1] : vector<16x16xf32> to vector<16xf32>
    %9 = vector.shape_cast %8 : vector<16xf32> to vector<16x1xf32>
    %10 = vector.broadcast %9 : vector<16x1xf32> to vector<16x16xf32>
    %11 = arith.subf %7, %10 : vector<16x16xf32>
    %12 = math.exp %11 : vector<16x16xf32>
    %cst_9 = arith.constant dense<0.000000e+00> : vector<16xf32>
    %13 = vector.multi_reduction <add>, %12, %cst_9 [1] : vector<16x16xf32> to vector<16xf32>
    %14 = vector.shape_cast %13 : vector<16xf32> to vector<16x1xf32>
    %15 = tpu.reciprocal %14 {approx = true} : vector<16x1xf32> -> vector<16x1xf32>
    %16 = vector.broadcast %15 : vector<16x1xf32> to vector<16x16xf32>
    %17 = arith.mulf %12, %16 : vector<16x16xf32>
    %c0_10 = arith.constant 0 : index
    %c0_11 = arith.constant 0 : index
    %18 = vector.load %arg4[%c0_10, %c0_11] : memref<16x17xf32, #tpu.memory_space<vmem>>, vector<16x17xf32>
    %cst_12 = arith.constant dense<0.000000e+00> : vector<16x17xf32>
    %19 = tpu.matmul %17, %18, %cst_12 {dimension_numbers = #tpu.dot_dimension_numbers<[1], [0], [0], [1], [0, 0, 1, 1], [], []>} : vector<16x16xf32>, vector<16x17xf32>, vector<16x17xf32> -> vector<16x17xf32>
    %cst_13 = arith.constant dense<0.000000e+00> : vector<16x17xf32>
    %20 = tpu.matmul %1, %19, %cst_13 {dimension_numbers = #tpu.dot_dimension_numbers<[1], [0], [0], [1], [0, 0, 1, 1], [], []>} : vector<16x16xf32>, vector<16x17xf32>, vector<16x17xf32> -> vector<16x17xf32>
    %c0_14 = arith.constant 0 : index
    %c0_15 = arith.constant 0 : index
    %21 = vector.load %arg5[%c0_14, %c0_15] : memref<1x17xf32, #tpu.memory_space<vmem>>, vector<1x17xf32>
    %22 = vector.broadcast %21 : vector<1x17xf32> to vector<16x17xf32>
    %23 = arith.addf %20, %22 : vector<16x17xf32>
    %c0_16 = arith.constant 0 : index
    %c0_17 = arith.constant 0 : index
    %24 = vector.load %arg6[%c0_16, %c0_17] : memref<8x16xf32, #tpu.memory_space<vmem>>, vector<8x16xf32>
    %c0_18 = arith.constant 0 : index
    %c0_19 = arith.constant 0 : index
    %25 = vector.load %arg7[%c0_18, %c0_19] : memref<16x8xf32, #tpu.memory_space<vmem>>, vector<16x8xf32>
    %26 = vector.extract_strided_slice %23 {offsets = [0, 16], sizes = [16, 1], strides = [1, 1]} : vector<16x17xf32> to vector<16x1xf32>
    %cst_20 = arith.constant 0.000000e+00 : f32
    %27 = vector.broadcast %cst_20 : f32 to vector<8x16xf32>
    %28 = arith.cmpf ogt, %24, %27 : vector<8x16xf32>
    %29 = tpu.transpose %26, [1, 0] : vector<16x1xf32> -> vector<1x16xf32>
    %cst_21 = arith.constant -1.000000e+30 : f32
    %30 = vector.shape_cast %29 : vector<1x16xf32> to vector<1x16xf32>
    %31 = vector.broadcast %30 : vector<1x16xf32> to vector<8x16xf32>
    %32 = vector.broadcast %cst_21 : f32 to vector<8x16xf32>
    %33 = arith.select %28, %31, %32 : vector<8x16xi1>, vector<8x16xf32>
    %cst_22 = arith.constant dense<0xFF800000> : vector<8xf32>
    %34 = vector.multi_reduction <maximumf>, %33, %cst_22 [1] : vector<8x16xf32> to vector<8xf32>
    %35 = vector.shape_cast %34 : vector<8xf32> to vector<8x1xf32>
    %cst_23 = arith.constant dense<0.000000e+00> : vector<16x1xf32>
    %36 = tpu.matmul %25, %35, %cst_23 {dimension_numbers = #tpu.dot_dimension_numbers<[1], [0], [0], [1], [0, 0, 1, 1], [], []>} : vector<16x8xf32>, vector<8x1xf32>, vector<16x1xf32> -> vector<16x1xf32>
    %37 = arith.subf %26, %36 : vector<16x1xf32>
    %38 = math.exp %37 : vector<16x1xf32>
    %cst_24 = arith.constant dense<0.000000e+00> : vector<8x1xf32>
    %39 = tpu.matmul %24, %38, %cst_24 {dimension_numbers = #tpu.dot_dimension_numbers<[1], [0], [0], [1], [0, 0, 1, 1], [], []>} : vector<8x16xf32>, vector<16x1xf32>, vector<8x1xf32> -> vector<8x1xf32>
    %cst_25 = arith.constant dense<0.000000e+00> : vector<16x1xf32>
    %40 = tpu.matmul %25, %39, %cst_25 {dimension_numbers = #tpu.dot_dimension_numbers<[1], [0], [0], [1], [0, 0, 1, 1], [], []>} : vector<16x8xf32>, vector<8x1xf32>, vector<16x1xf32> -> vector<16x1xf32>
    %41 = tpu.reciprocal %40 {approx = true} : vector<16x1xf32> -> vector<16x1xf32>
    %42 = arith.mulf %38, %41 : vector<16x1xf32>
    %43 = vector.broadcast %42 : vector<16x1xf32> to vector<16x17xf32>
    %44 = arith.mulf %43, %23 : vector<16x17xf32>
    %cst_26 = arith.constant dense<0.000000e+00> : vector<8x17xf32>
    %45 = tpu.matmul %24, %44, %cst_26 {dimension_numbers = #tpu.dot_dimension_numbers<[1], [0], [0], [1], [0, 0, 1, 1], [], []>} : vector<8x16xf32>, vector<16x17xf32>, vector<8x17xf32> -> vector<8x17xf32>
    %c0_27 = arith.constant 0 : index
    %c0_28 = arith.constant 0 : index
    %46 = vector.load %arg8[%c0_27, %c0_28] : memref<32x9xf32, #tpu.memory_space<vmem>>, vector<32x9xf32>
    %c0_29 = arith.constant 0 : index
    %c0_30 = arith.constant 0 : index
    %47 = vector.load %arg9[%c0_29, %c0_30] : memref<9x8xf32, #tpu.memory_space<vmem>>, vector<9x8xf32>
    %cst_31 = arith.constant dense<0.000000e+00> : vector<32x8xf32>
    %48 = tpu.matmul %46, %47, %cst_31 {dimension_numbers = #tpu.dot_dimension_numbers<[1], [0], [0], [1], [0, 0, 1, 1], [], []>} : vector<32x9xf32>, vector<9x8xf32>, vector<32x8xf32> -> vector<32x8xf32>
    %cst_32 = arith.constant dense<0xFF800000> : vector<32xf32>
    %49 = vector.multi_reduction <maximumf>, %48, %cst_32 [1] : vector<32x8xf32> to vector<32xf32>
    %50 = vector.shape_cast %49 : vector<32xf32> to vector<32x1xf32>
    %51 = vector.broadcast %50 : vector<32x1xf32> to vector<32x8xf32>
    %52 = arith.subf %48, %51 : vector<32x8xf32>
    %53 = math.exp %52 : vector<32x8xf32>
    %cst_33 = arith.constant dense<0.000000e+00> : vector<32xf32>
    %54 = vector.multi_reduction <add>, %53, %cst_33 [1] : vector<32x8xf32> to vector<32xf32>
    %55 = vector.shape_cast %54 : vector<32xf32> to vector<32x1xf32>
    %56 = tpu.reciprocal %55 {approx = true} : vector<32x1xf32> -> vector<32x1xf32>
    %57 = vector.broadcast %56 : vector<32x1xf32> to vector<32x8xf32>
    %58 = arith.mulf %53, %57 : vector<32x8xf32>
    %c0_34 = arith.constant 0 : index
    %c0_35 = arith.constant 0 : index
    %59 = vector.load %arg10[%c0_34, %c0_35] : memref<8x8xf32, #tpu.memory_space<vmem>>, vector<8x8xf32>
    %cst_36 = arith.constant dense<0.000000e+00> : vector<32x8xf32>
    %60 = tpu.matmul %58, %59, %cst_36 {dimension_numbers = #tpu.dot_dimension_numbers<[1], [0], [0], [1], [0, 0, 1, 1], [], []>} : vector<32x8xf32>, vector<8x8xf32>, vector<32x8xf32> -> vector<32x8xf32>
    %c0_37 = arith.constant 0 : index
    %c0_38 = arith.constant 0 : index
    %61 = vector.load %arg11[%c0_37, %c0_38] : memref<1x8xf32, #tpu.memory_space<vmem>>, vector<1x8xf32>
    %62 = vector.broadcast %61 : vector<1x8xf32> to vector<32x8xf32>
    %63 = arith.addf %60, %62 : vector<32x8xf32>
    %c0_39 = arith.constant 0 : index
    %c0_40 = arith.constant 0 : index
    %64 = vector.load %arg12[%c0_39, %c0_40] : memref<8x32xf32, #tpu.memory_space<vmem>>, vector<8x32xf32>
    %cst_41 = arith.constant dense<0.000000e+00> : vector<8x8xf32>
    %65 = tpu.matmul %64, %63, %cst_41 {dimension_numbers = #tpu.dot_dimension_numbers<[1], [0], [0], [1], [0, 0, 1, 1], [], []>} : vector<8x32xf32>, vector<32x8xf32>, vector<8x8xf32> -> vector<8x8xf32>
    %c0_42 = arith.constant 0 : index
    %c0_43 = arith.constant 0 : index
    %66 = vector.load %arg13[%c0_42, %c0_43] : memref<17x128xf32, #tpu.memory_space<vmem>>, vector<17x128xf32>
    %cst_44 = arith.constant dense<0.000000e+00> : vector<8x128xf32>
    %67 = tpu.matmul %45, %66, %cst_44 {dimension_numbers = #tpu.dot_dimension_numbers<[1], [0], [0], [1], [0, 0, 1, 1], [], []>} : vector<8x17xf32>, vector<17x128xf32>, vector<8x128xf32> -> vector<8x128xf32>
    %c0_45 = arith.constant 0 : index
    %c0_46 = arith.constant 0 : index
    %68 = vector.load %arg14[%c0_45, %c0_46] : memref<8x128xf32, #tpu.memory_space<vmem>>, vector<8x128xf32>
    %cst_47 = arith.constant dense<0.000000e+00> : vector<8x128xf32>
    %69 = tpu.matmul %65, %68, %cst_47 {dimension_numbers = #tpu.dot_dimension_numbers<[1], [0], [0], [1], [0, 0, 1, 1], [], []>} : vector<8x8xf32>, vector<8x128xf32>, vector<8x128xf32> -> vector<8x128xf32>
    %70 = arith.addf %67, %69 : vector<8x128xf32>
    %c0_48 = arith.constant 0 : index
    %c0_49 = arith.constant 0 : index
    %71 = vector.load %arg18[%c0_48, %c0_49] : memref<8x128xf32, #tpu.memory_space<vmem>>, vector<8x128xf32>
    tpu.vector_store %arg18[%c0_48, %c0_49], %70 {strides = array<i32>} : memref<8x128xf32, #tpu.memory_space<vmem>>, vector<8x128xf32>,
    %c0_50 = arith.constant 0 : index
    %c0_51 = arith.constant 0 : index
    %72 = vector.load %arg15[%c0_50, %c0_51] : memref<128x128xf32, #tpu.memory_space<vmem>>, vector<128x128xf32>
    %cst_52 = arith.constant dense<0.000000e+00> : vector<8x128xf32>
    %73 = tpu.matmul %70, %72, %cst_52 {dimension_numbers = #tpu.dot_dimension_numbers<[1], [0], [0], [1], [0, 0, 1, 1], [], []>} : vector<8x128xf32>, vector<128x128xf32>, vector<8x128xf32> -> vector<8x128xf32>
    %c0_53 = arith.constant 0 : index
    %c0_54 = arith.constant 0 : index
    %74 = vector.load %arg16[%c0_53, %c0_54] : memref<1x128xf32, #tpu.memory_space<vmem>>, vector<1x128xf32>
    %75 = vector.broadcast %74 : vector<1x128xf32> to vector<8x128xf32>
    %76 = arith.addf %73, %75 : vector<8x128xf32>
    %c0_55 = arith.constant 0 : index
    %c0_56 = arith.constant 0 : index
    %77 = vector.load %arg17[%c0_55, %c0_56] : memref<8x128xf32, #tpu.memory_space<vmem>>, vector<8x128xf32>
    tpu.vector_store %arg17[%c0_55, %c0_56], %76 {strides = array<i32>} : memref<8x128xf32, #tpu.memory_space<vmem>>, vector<8x128xf32>,
    return
  }
}

</mosaic_0001>

<bundles_post_ra>
// kernel: mul.1
= control target key start
LH: loop header
LB: loop body
LE: loop exit
PB: predicated region body
PF: predicated region fallthrough
CT: control target
= control target key end

     0   :  { %s34_s0 = inlined_call_operand.vmem [shape: f32[48], index: 0, kind: input, shape index: {}]   ;;  %s35_s1 = inlined_call_operand.vmem [shape: f32[48], index: 1, kind: input, shape index: {}]   ;;  %s36_s2 = inlined_call_operand.vmem [shape: f32[48], index: 2, kind: output, shape index: {}]  }
   0x1   :  { %v3_v0 = vld [vmem:[%s34_s0] sm:$0x1] }
   0x2   :  { %v4_v1 = vld [vmem:[%s35_s1] sm:$0x1] }
   0x3   :  { %v7_v2 = vmul.f32 %v4_v1, %v3_v0 }
   0x5   :  { %9 = vst [vmem:[%s36_s2] sm:$0x1] %v7_v2 }

// kernel: graph_model_forward.1
= control target key start
LH: loop header
LB: loop body
LE: loop exit
PB: predicated region body
PF: predicated region fallthrough
CT: control target
= control target key end

     0   :  { %vm63_vm0 = vcmask 64512   ;;  %vm97_vm1 = vcmask 130048   ;;  %vm416_vm3 = vcmask 1040384   ;;  %vm403_vm4 = vcmask 72704   ;;  %s1035_s2 = inlined_call_operand.vmem [shape: f32[8,16], index: 2, kind: input, shape index: {}]   ;;  %s1036_s0 = inlined_call_operand.vmem [shape: f32[16,8], index: 0, kind: input, shape index: {}]   ;;  %s1037_s3 = inlined_call_operand.vmem [shape: f32[1,16], index: 3, kind: input, shape index: {}]   ;;  %s1038_s1 = inlined_call_operand.vmem [shape: f32[16,16], index: 1, kind: input, shape index: {}]   ;;  %s1039_s4 = inlined_call_operand.vmem [shape: f32[16,17], index: 4, kind: input, shape index: {}]   ;;  %s1040_s5 = inlined_call_operand.vmem [shape: f32[1,17], index: 5, kind: input, shape index: {}]   ;;  %s1041_s6 = inlined_call_operand.vmem [shape: f32[8,16], index: 6, kind: input, shape index: {}]   ;;  %s1042_s7 = inlined_call_operand.vmem [shape: f32[16,8], index: 7, kind: input, shape index: {}]   ;;  %s1043_s9 = inlined_call_operand.vmem [shape: f32[9,8], index: 9, kind: input, shape index: {}]   ;;  %s1044_s8 = inlined_call_operand.vmem [shape: f32[32,9], index: 8, kind: input, shape index: {}]   ;;  %s1045_s10 = inlined_call_operand.vmem [shape: f32[8,8], index: 10, kind: input, shape index: {}]   ;;  %s1046_s11 = inlined_call_operand.vmem [shape: f32[1,8], index: 11, kind: input, shape index: {}]   ;;  %s1047_s12 = inlined_call_operand.vmem [shape: f32[8,32], index: 12, kind: input, shape index: {}]   ;;  %s1048_s13 = inlined_call_operand.vmem [shape: f32[17,128], index: 13, kind: input, shape index: {}]   ;;  %s1049_s14 = inlined_call_operand.vmem [shape: f32[8,128], index: 14, kind: input, shape index: {}]   ;;  %s1050_s15 = inlined_call_operand.vmem [shape: f32[128,128], index: 15, kind: input, shape index: {}]   ;;  %s1051_s16 = inlined_call_operand.vmem [shape: f32[1,128], index: 16, kind: input, shape index: {}]   ;;  %s1052_s18 = inlined_call_operand.vmem [shape: f32[8,128], index: 18, kind: output, shape index: {1}]   ;;  %s1053_s17 = inlined_call_operand.vmem [shape: f32[8,128], index: 17, kind: output, shape index: {0}]  }
   0x1   :  { %1055 = sst [smem:[#allocation2_spill]] %s1035_s2  ;;  %v60_v5 = vld [vmem:[%s1038_s1] sm:$0xff]  ;;  %v61_v6 = vld [vmem:[%s1038_s1 + $0x8] sm:$0xff]  ;;  %s745_s2 = smov 112   ;;  %vm540_vm5 = vcmask 261120   ;;  %vm591_vm6 = vcmask 138240  }
   0x2   :  { %1056 = sst [smem:[#allocation3_spill]] %s1036_s0  ;;  %v150_v24 = vld [vmem:[%s1039_s4 + $0x8] sm:$0xff]  ;;  %v149_v25 = vld [vmem:[%s1039_s4] sm:$0xff] }
   0x3   :  { %1057 = sst [smem:[#allocation4_spill]] %s1037_s3  ;;  %v710_v34 = vld [vmem:[%s1040_s5] ss:$0 sm:$0xff]  ;;  %v209_v48 = vld [vmem:[%s1042_s7 + $0x8] sm:$0xff] }
   0x4   :  { %s1058_s29 = sld [smem:[#allocation2_spill]]  ;;  %v893_v41 = vld [vmem:[%s1041_s6] sm:$0xff]  ;;  %s746_s6 = smov 16   ;;  %v402_v63 = vld [vmem:[%s1043_s9 + $0x8] sm:$0x1] }
   0x5   :  { %s1059_s19 = sld [smem:[#allocation3_spill]]  ;;  %vm210_vm2 = vcmp.gt.f32.partialorder %v893_v41, 0.0  ;;  %v208_v46 = vld [vmem:[%s1042_s7] sm:$0xff] }
   0x6   :  { %s1060_s26 = sld [smem:[#allocation4_spill]] }
   0xa   :  { %v62_v0 = vld [vmem:[%s1058_s29] sm:$0xff] }
   0xb   :  { %v58_v1 = vld [vmem:[%s1059_s19] sm:$0xff]  ;;  %85 = vmatpush.msra.mxu0 %v62_v0  ;;  %v59_v2 = vld [vmem:[%s1059_s19 + $0x8] sm:$0xff] }
   0xc   :  { %668 = vmatmul.msk.f32.vlgmr.msra.gmra.mxu0 %vm63_vm0, %v58_v1  ;;  %v709_v7 = vld [vmem:[%s1060_s26] ss:$0 sm:$0xff] }
   0xd   :  { %v401_v0 = vld [vmem:[%s1043_s9] sm:$0xff] }
   0xe   :  { %v397_v1 = vld [vmem:[%s1044_s8] sm:$0xff] }
  0x14   :  { %669 = vmatmul.msk.f32.gmra.mxu0 %vm63_vm0, %v59_v2  ;;  %v398_v2 = vld [vmem:[%s1044_s8 + $0x8] sm:$0xff] }
  0x89   :  { %v87_v3 = vpop.f32.mrf.mxu0 }
  0x91   :  { %v90_v4 = vpop.f32.mrf.mxu0 }
  0x92   :  { %118 = vmatpush.msrb.mxu0 %v90_v4  ;;  %695 = vmatpush.msra.mxu2 %v90_v4  ;;  %v400_v4 = vld [vmem:[%s1044_s8 + $0x18] sm:$0xff] }
  0x94   :  { %119 = vmatpush.msrb.mxu0 %v87_v3  ;;  %696 = vmatpush.msra.mxu2 %v87_v3  ;;  %v399_v3 = vld [vmem:[%s1044_s8 + $0x10] sm:$0xff] }
  0x95   :  { %670 = vmatmul.msk.f32.vlgmr.msrb.gmra.mxu0 %vm97_vm1, %v60_v5  ;;  %671 = vmatmul.msk.f32.vlgmr.msra.gmra.mxu2 %vm97_vm1, %v61_v6 }
  0x96   :  { %171 = vmatpush.msrb.mxu2 %v150_v24 }
  0x98   :  { %172 = vmatpush.msrb.mxu2 %v149_v25 }
 0x112   :  { %v121_v8 = vpop.f32.mrf.mxu0 }
 0x113   :  { %v122_v9 = vadd.f32 %v709_v7, %v121_v8 }
 0x115   :  { %v127_v10 = vsel %vm97_vm1, %v122_v9, -inf }
 0x116   :  { %128 = vmax.xlane.f32.xlu0 %v127_v10 }
 0x118   :  { %v124_v11 = vpop.f32.mrf.mxu2 }
 0x119   :  { %v125_v12 = vadd.f32 %v709_v7, %v124_v11 }
 0x11b   :  { %v130_v13 = vsel %vm97_vm1, %v125_v12, -inf }
 0x11e   :  { %131 = vmax.xlane.f32.xlu0 %v130_v13 }
 0x189   :  { %v129_v14 = vpop.xlane.xlu0 %128 }
 0x18a   :  { %v133_v15 = vsub.f32 %v122_v9, %v129_v14 }
 0x18c   :  { %v135_v16 = vmul.f32 1.442695, %v133_v15 }
 0x18e   :  { %713 = vpow2.f32 %v135_v16 }
 0x191   :  { %v132_v17 = vpop.xlane.xlu0 %131 }
 0x192   :  { %v134_v18 = vsub.f32 %v125_v12, %v132_v17 }
 0x194   :  { %v714_v19 = vpop.eup %713  ;;  %v137_v20 = vmul.f32 1.442695, %v134_v18 }
 0x195   :  { %v139_v21 = vsel %vm97_vm1, %v714_v19, 0.0 }
 0x196   :  { %715 = vpow2.f32 %v137_v20  ;;  %140 = vadd.xlane.f32.xlu1 %v139_v21 }
 0x19c   :  { %v716_v22 = vpop.eup %715 }
 0x19d   :  { %v142_v23 = vsel %vm97_vm1, %v716_v22, 0.0 }
 0x19e   :  { %143 = vadd.xlane.f32.xlu1 %v142_v23  ;;  %v747_v23 = vmov 16  }
 0x19f   :  { %706 = vset.pattern.permute.xlu1 %v747_v23  ;;  %707 = vset.pattern.permute.xlu2 %v747_v23 }
 0x209   :  { %v141_v26 = vpop.xlane.xlu1 %140 }
 0x20a   :  { %717 = vrcp.f32 %v141_v26 }
 0x210   :  { %v718_v27 = vpop.eup %717 }
 0x211   :  { %v144_v28 = vpop.xlane.xlu1 %143  ;;  %v147_v29 = vmul.f32 %v718_v27, %v714_v19 }
 0x212   :  { %719 = vrcp.f32 %v144_v28 }
 0x213   :  { %672 = vmatmul.msk.f32.vlgmr.msrb.gmra.mxu2 %vm97_vm1, %v147_v29 }
 0x218   :  { %v720_v30 = vpop.eup %719 }
 0x219   :  { %v148_v31 = vmul.f32 %v720_v30, %v716_v22 }
 0x21b   :  { %673 = vmatmul.msk.f32.gmra.mxu2 %vm97_vm1, %v148_v31 }
 0x296   :  { %v174_v32 = vpop.f32.mrf.mxu2 }
 0x29e   :  { %v177_v33 = vpop.f32.mrf.mxu2 }
 0x29f   :  { %198 = vmatpush.msra.mxu3 %v177_v33 }
 0x2a1   :  { %199 = vmatpush.msra.mxu3 %v174_v32 }
 0x2a2   :  { %674 = vmatmul.msk.f32.vlgmr.msra.gmra.mxu3 %vm97_vm1, %v60_v5 }
 0x2aa   :  { %675 = vmatmul.msk.f32.gmra.mxu3 %vm97_vm1, %v61_v6 }
 0x325   :  { %v201_v35 = vpop.f32.mrf.mxu3 }
 0x326   :  { %v882_v36 = vadd.f32 %v710_v34, %v201_v35 }
 0x328   :  { %213 = vrot.lane.b32.xlu2 %v882_v36, %s745_s2 }
 0x32d   :  { %v204_v37 = vpop.f32.mrf.mxu3 }
 0x32e   :  { %v886_v38 = vadd.f32 %v710_v34, %v204_v37 }
 0x330   :  { %215 = vrot.lane.b32.xlu2 %v886_v38, %s745_s2 }
 0x382   :  { %v214_v39 = vpop.permute.xlu2 %213 }
 0x383   :  { %219 = vxpose.xlu0.b32.start [1/2] (short) (narrow) %v214_v39, 8 }
 0x38a   :  { %v216_v40 = vpop.permute.xlu2 %215 }
 0x38b   :  { %220 = vxpose.xlu0.b32.end [2/2] (short) (narrow) %v216_v40, 8 }
 0x3f2   :  { %708 = vset.pattern.permute.xlu0 %v747_v23  ;;  %v622_v23 = vld [vmem:[%s1050_s15 + $0x18] sm:$0xff] }
 0x427   :  { %v235_v42 = vpop.trf.xlu0 }
 0x428   :  { %v251_v43 = vperm.slane %v235_v42, 0 }
 0x42a   :  { %v252_v44 = vsel %vm210_vm2, %v251_v43, -1e+30 }
 0x42b   :  { %v253_v45 = vsel %vm97_vm1, %v252_v44, -inf }
 0x42c   :  { %254 = vmax.xlane.f32.xlu1 %v253_v45 }
 0x49f   :  { %v255_v47 = vpop.xlane.xlu1 %254 }
 0x4a0   :  { %277 = vmatpush.msra.mxu0 %v255_v47 }
 0x4a1   :  { %676 = vmatmul.msk.f32.vlgmr.msra.gmra.mxu0 %vm63_vm0, %v208_v46 }
 0x4a9   :  { %677 = vmatmul.msk.f32.gmra.mxu0 %vm63_vm0, %v209_v48 }
 0x51e   :  { %v279_v49 = vpop.f32.mrf.mxu0 }
 0x51f   :  { %287 = vrot.lane.b32.xlu1 %v279_v49, %s746_s6 }
 0x526   :  { %v282_v50 = vpop.f32.mrf.mxu0 }
 0x527   :  { %289 = vrot.lane.b32.xlu2 %v282_v50, %s746_s6 }
 0x581   :  { %v290_v51 = vpop.permute.xlu2 %289 }
 0x582   :  { %v294_v52 = vsub.f32 %v886_v38, %v290_v51  ;;  %v493_v51 = vld [vmem:[%s1045_s10] sm:$0xff] }
 0x584   :  { %v297_v53 = vmul.f32 1.442695, %v294_v52 }
 0x586   :  { %721 = vpow2.f32 %v297_v53 }
 0x58c   :  { %v909_v57 = vpop.eup %721 }
 0x591   :  { %v288_v54 = vpop.permute.xlu1 %287 }
 0x592   :  { %v293_v55 = vsub.f32 %v882_v36, %v288_v54 }
 0x594   :  { %v295_v56 = vmul.f32 1.442695, %v293_v55 }
 0x596   :  { %723 = vpow2.f32 %v295_v56 }
 0x59c   :  { %v724_v58 = vpop.eup %723 }
 0x59d   :  { %v701_v59 = vpack.i.bf16 %v724_v58, %v909_v57 }
 0x59f   :  { %702 = vrot.lane.b32.xlu2 %v701_v59, %s745_s2 }
 0x5f9   :  { %v703_v60 = vpop.permute.xlu2 %702 }
 0x5fa   :  { %v704_v61 = vunpack.i.l.bf16 %v703_v60  ;;  %v705_v62 = vunpack.i.h.bf16 %v703_v60 }
 0x5fc   :  { %324 = vmatpush.msra.mxu1 %v704_v61 }
 0x5fe   :  { %325 = vmatpush.msra.mxu1 %v705_v62 }
 0x5ff   :  { %678 = vmatmul.msk.f32.vlgmr.msra.gmra.mxu1 %vm97_vm1, %v893_v41 }
 0x600   :  { %682 = vmatpush.msk.msrb.mxu1 %vm416_vm3, %v402_v63 }
 0x602   :  { %435 = vmatpush.msrb.mxu1 %v401_v0  ;;  %v711_v0 = vld [vmem:[%s1046_s11] ss:$0 sm:$0xff] }
 0x607   :  { %683 = vmatmul.msk.f32.vlgmr.msrb.gmra.mxu1 %vm403_vm4, %v397_v1 }
 0x60f   :  { %684 = vmatmul.msk.f32.gmra.mxu1 %vm403_vm4, %v398_v2 }
 0x617   :  { %685 = vmatmul.msk.f32.gmra.mxu1 %vm403_vm4, %v399_v3 }
 0x61f   :  { %686 = vmatmul.msk.f32.gmra.mxu1 %vm403_vm4, %v400_v4 }
 0x67c   :  { %v327_v5 = vpop.f32.mrf.mxu1 }
 0x67d   :  { %345 = vmatpush.msra.mxu2 %v327_v5 }
 0x67e   :  { %679 = vmatmul.msk.f32.vlgmr.msra.gmra.mxu2 %vm63_vm0, %v208_v46 }
 0x684   :  { %v437_v6 = vpop.f32.mrf.mxu1 }
 0x685   :  { %v449_v7 = vsel %vm63_vm0, %v437_v6, -inf }
 0x686   :  { %450 = vmax.xlane.f32.xlu2 %v449_v7  ;;  %680 = vmatmul.msk.f32.gmra.mxu2 %vm63_vm0, %v209_v48  ;;  %v566_v7 = vld [vmem:[%s1048_s13 + $0x10] sm:$0x1] }
 0x68c   :  { %v440_v8 = vpop.f32.mrf.mxu1 }
 0x68d   :  { %v452_v22 = vsel %vm63_vm0, %v440_v8, -inf }
 0x694   :  { %v443_v9 = vpop.f32.mrf.mxu1 }
 0x695   :  { %v455_v10 = vsel %vm63_vm0, %v443_v9, -inf }
 0x696   :  { %456 = vmax.xlane.f32.xlu2 %v455_v10  ;;  %v567_v10 = vld [vmem:[%s1049_s14] sm:$0xff] }
 0x697   :  { %586 = vmatpush.msrb.mxu2 %v567_v10 }
 0x69c   :  { %v446_v11 = vpop.f32.mrf.mxu1 }
 0x69d   :  { %v458_v12 = vsel %vm63_vm0, %v446_v11, -inf }
 0x69e   :  { %459 = vmax.xlane.f32.xlu2 %v458_v12  ;;  %v633_v12 = vld [vmem:[%s1050_s15 + $0x70] sm:$0xff] }
 0x6f9   :  { %v451_v13 = vpop.xlane.xlu2 %450 }
 0x6fa   :  { %v461_v14 = vsub.f32 %v437_v6, %v451_v13  ;;  %v539_v6 = vld [vmem:[%s1047_s12] sm:$0xff]  ;;  %v632_v13 = vld [vmem:[%s1050_s15 + $0x68] sm:$0xff] }
 0x6fc   :  { %v465_v15 = vmul.f32 1.442695, %v461_v14  ;;  %v631_v14 = vld [vmem:[%s1050_s15 + $0x60] sm:$0xff] }
 0x6fe   :  { %725 = vpow2.f32 %v465_v15  ;;  %v630_v15 = vld [vmem:[%s1050_s15 + $0x58] sm:$0xff] }
 0x701   :  { %v347_v16 = vpop.f32.mrf.mxu2 }
 0x702   :  { %727 = vrcp.f32 %v347_v16  ;;  %v629_v16 = vld [vmem:[%s1050_s15 + $0x50] sm:$0xff] }
 0x704   :  { %v726_v17 = vpop.eup %725 }
 0x705   :  { %v473_v18 = vsel %vm63_vm0, %v726_v17, 0.0 }
 0x706   :  { %474 = vadd.xlane.f32.xlu2 %v473_v18  ;;  %v627_v18 = vld [vmem:[%s1050_s15 + $0x40] sm:$0xff] }
 0x708   :  { %v728_v19 = vpop.eup %727 }
 0x709   :  { %357 = vrot.lane.b32.xlu0 %v728_v19, %s746_s6  ;;  %v350_v20 = vpop.f32.mrf.mxu2  ;;  %v457_v28 = vpop.xlane.xlu2 %456  ;;  %v626_v19 = vld [vmem:[%s1050_s15 + $0x38] sm:$0xff] }
 0x70a   :  { %729 = vrcp.f32 %v350_v20  ;;  %v463_v29 = vsub.f32 %v443_v9, %v457_v28  ;;  %v564_v9 = vld [vmem:[%s1048_s13] sm:$0xff]  ;;  %v625_v20 = vld [vmem:[%s1050_s15 + $0x30] sm:$0xff] }
 0x70c   :  { %v469_v30 = vmul.f32 1.442695, %v463_v29 }
 0x70e   :  { %731 = vpow2.f32 %v469_v30 }
 0x710   :  { %v730_v21 = vpop.eup %729 }
 0x711   :  { %359 = vrot.lane.b32.xlu1 %v730_v21, %s746_s6  ;;  %v460_v31 = vpop.xlane.xlu2 %459  ;;  %v624_v21 = vld [vmem:[%s1050_s15 + $0x28] sm:$0xff] }
 0x712   :  { %v464_v32 = vsub.f32 %v446_v11, %v460_v31  ;;  %v634_v11 = vld [vmem:[%s1050_s15 + $0x78] sm:$0xff]  ;;  %v712_v31 = vld [vmem:[%s1051_s16] ss:$0 sm:$0xff] }
 0x713   :  { %639 = vmatpush.msra.mxu1 %v634_v11 }
 0x714   :  { %v471_v33 = vmul.f32 1.442695, %v464_v32  ;;  %v732_v34 = vpop.eup %731 }
 0x715   :  { %v479_v37 = vsel %vm63_vm0, %v732_v34, 0.0  ;;  %640 = vmatpush.msra.mxu1 %v633_v12 }
 0x716   :  { %733 = vpow2.f32 %v471_v33 }
 0x717   :  { %641 = vmatpush.msra.mxu1 %v632_v13 }
 0x719   :  { %642 = vmatpush.msra.mxu1 %v631_v14 }
 0x71b   :  { %643 = vmatpush.msra.mxu1 %v630_v15 }
 0x71c   :  { %v734_v42 = vpop.eup %733 }
 0x71d   :  { %v482_v43 = vsel %vm63_vm0, %v734_v42, 0.0  ;;  %644 = vmatpush.msra.mxu1 %v629_v16 }
 0x73b   :  { %453 = vmax.xlane.f32.xlu1 %v452_v22  ;;  %v623_v22 = vld [vmem:[%s1050_s15 + $0x20] sm:$0xff] }
 0x779   :  { %v475_v46 = vpop.xlane.xlu2 %474 }
 0x77b   :  { %v358_v24 = vpop.permute.xlu0 %357 }
 0x77c   :  { %v363_v25 = vmul.f32 %v724_v58, %v358_v24 }
 0x77e   :  { %367 = vperm.xlu1 %706, %v363_v25   ;;  %v621_v25 = vld [vmem:[%s1050_s15 + $0x10] sm:$0xff] }
 0x783   :  { %v360_v26 = vpop.permute.xlu1 %359 }
 0x784   :  { %v364_v27 = vmul.f32 %v909_v57, %v360_v26  ;;  %v620_v26 = vld [vmem:[%s1050_s15 + $0x8] sm:$0xff] }
 0x786   :  { %372 = vperm.xlu2 %707, %v364_v27   ;;  %v619_v27 = vld [vmem:[%s1050_s15] sm:$0xff] }
 0x7ae   :  { %v454_v35 = vpop.xlane.xlu1 %453 }
 0x7af   :  { %v462_v39 = vsub.f32 %v440_v8, %v454_v35  ;;  %480 = vadd.xlane.f32.xlu2 %v479_v37  ;;  %v565_v8 = vld [vmem:[%s1048_s13 + $0x8] sm:$0xff] }
 0x7b1   :  { %v467_v40 = vmul.f32 1.442695, %v462_v39 }
 0x7b3   :  { %735 = vpow2.f32 %v467_v40 }
 0x7b4   :  { %737 = vrcp.f32 %v475_v46 }
 0x7b7   :  { %483 = vadd.xlane.f32.xlu2 %v482_v43 }
 0x7b9   :  { %v736_v44 = vpop.eup %735 }
 0x7ba   :  { %v476_v45 = vsel %vm63_vm0, %v736_v44, 0.0  ;;  %v738_v52 = vpop.eup %737 }
 0x7bb   :  { %477 = vadd.xlane.f32.xlu1 %v476_v45  ;;  %v489_v53 = vmul.f32 %v738_v52, %v726_v17  ;;  %v628_v17 = vld [vmem:[%s1050_s15 + $0x48] sm:$0xff] }
 0x7bc   :  { %645 = vmatpush.msra.mxu1 %v628_v17 }
 0x7be   :  { %646 = vmatpush.msra.mxu1 %v627_v18 }
 0x7c0   :  { %647 = vmatpush.msra.mxu1 %v626_v19 }
 0x7c2   :  { %648 = vmatpush.msra.mxu1 %v625_v20 }
 0x7c4   :  { %649 = vmatpush.msra.mxu1 %v624_v21 }
 0x7c6   :  { %650 = vmatpush.msra.mxu1 %v623_v22 }
 0x7c8   :  { %651 = vmatpush.msra.mxu1 %v622_v23 }
 0x7ca   :  { %652 = vmatpush.msra.mxu1 %v621_v25 }
 0x7cc   :  { %653 = vmatpush.msra.mxu1 %v620_v26 }
 0x7ce   :  { %654 = vmatpush.msra.mxu1 %v619_v27 }
 0x7e0   :  { %v373_v47 = vpop.permute.xlu2 %372 }
 0x7e1   :  { %v376_v48 = vmul.f32 %v373_v47, %v886_v38 }
 0x7e3   :  { %391 = vmatpush.msrb.mxu3 %v376_v48 }
 0x7f0   :  { %v368_v49 = vpop.permute.xlu1 %367 }
 0x7f1   :  { %v375_v50 = vmul.f32 %v368_v49, %v882_v36 }
 0x7f3   :  { %392 = vmatpush.msrb.mxu3 %v375_v50 }
 0x7f4   :  { %681 = vmatmul.msk.f32.vlgmr.msrb.gmra.mxu3 %vm97_vm1, %v893_v41 }
 0x7f5   :  { %525 = vmatpush.msra.mxu3 %v493_v51 }
 0x7fc   :  { %687 = vmatmul.msk.f32.vlgmr.msra.gmra.mxu3 %vm63_vm0, %v489_v53 }
 0x822   :  { %v481_v38 = vpop.xlane.xlu2 %480 }
 0x82a   :  { %v484_v36 = vpop.xlane.xlu2 %483 }
 0x82e   :  { %v478_v54 = vpop.xlane.xlu1 %477 }
 0x82f   :  { %739 = vrcp.f32 %v478_v54 }
 0x830   :  { %741 = vrcp.f32 %v481_v38 }
 0x831   :  { %743 = vrcp.f32 %v484_v36 }
 0x835   :  { %v740_v55 = vpop.eup %739 }
 0x836   :  { %v490_v56 = vmul.f32 %v740_v55, %v736_v44  ;;  %v742_v57 = vpop.eup %741 }
 0x837   :  { %v491_v58 = vmul.f32 %v742_v57, %v732_v34  ;;  %v744_v41 = vpop.eup %743 }
 0x838   :  { %688 = vmatmul.msk.f32.gmra.mxu3 %vm63_vm0, %v490_v56  ;;  %v492_v59 = vmul.f32 %v744_v41, %v734_v42 }
 0x840   :  { %689 = vmatmul.msk.f32.gmra.mxu3 %vm63_vm0, %v491_v58 }
 0x848   :  { %690 = vmatmul.msk.f32.gmra.mxu3 %vm63_vm0, %v492_v59 }
 0x877   :  { %v394_v60 = vpop.f32.mrf.mxu3 }
 0x87f   :  { %v527_v61 = vpop.f32.mrf.mxu3 }
 0x880   :  { %v528_v5 = vadd.f32 %v711_v0, %v527_v61 }
 0x8bb   :  { %v530_v62 = vpop.f32.mrf.mxu3 }
 0x8bc   :  { %v531_v4 = vadd.f32 %v711_v0, %v530_v62 }
 0x8c3   :  { %v533_v63 = vpop.f32.mrf.mxu3 }
 0x8c4   :  { %v534_v3 = vadd.f32 %v711_v0, %v533_v63 }
 0x8cb   :  { %v536_v1 = vpop.f32.mrf.mxu3 }
 0x8cc   :  { %v537_v2 = vadd.f32 %v711_v0, %v536_v1 }
 0x8ce   :  { %556 = vmatpush.msrb.mxu0 %v537_v2 }
 0x8d0   :  { %557 = vmatpush.msrb.mxu0 %v534_v3 }
 0x8d2   :  { %558 = vmatpush.msrb.mxu0 %v531_v4 }
 0x8d4   :  { %559 = vmatpush.msrb.mxu0 %v528_v5 }
 0x8d5   :  { %691 = vmatmul.msk.f32.vlgmr.msrb.gmra.mxu0 %vm540_vm5, %v539_v6 }
 0x8d6   :  { %693 = vmatpush.msk.msra.mxu0 %vm416_vm3, %v566_v7 }
 0x8d8   :  { %612 = vmatpush.msra.mxu0 %v565_v8 }
 0x8da   :  { %613 = vmatpush.msra.mxu0 %v564_v9 }
 0x8dd   :  { %694 = vmatmul.msk.f32.vlgmr.msra.gmra.mxu0 %vm591_vm6, %v394_v60 }
 0x952   :  { %v561_v24 = vpop.f32.mrf.mxu0 }
 0x953   :  { %692 = vmatmul.msk.f32.vlgmr.msrb.gmra.mxu2 %vm63_vm0, %v561_v24 }
 0x95a   :  { %v615_v28 = vpop.f32.mrf.mxu0 }
 0x9d6   :  { %v588_v29 = vpop.f32.mrf.mxu2 }
 0x9d7   :  { %v616_v30 = vadd.f32 %v615_v28, %v588_v29 }
 0x9d9   :  { %618 = vst [vmem:[%s1052_s18] sm:$0xff] %v616_v30  ;;  %655 = vmatmul.f32.vlgmr.msra.gmra.mxu1 %v616_v30 }
 0xa56   :  { %v656_v32 = vpop.f32.mrf.mxu1 }
 0xa57   :  { %v657_v33 = vadd.f32 %v712_v31, %v656_v32 }
 0xa59   :  { %659 = vst [vmem:[%s1053_s17] sm:$0xff] %v657_v33 }

</bundles_post_ra>
